<compile_context>
chip_gen: v7x
topology: tpu7x:2x2x1
jax: 0.10.0
libtpu: 0.0.40
codegen_flags: <defaults>
</compile_context>

<pallas_src>
import functools

import jax
import jax.numpy as jnp
from jax import lax
from jax.experimental import pallas as pl
from jax.experimental.pallas import tpu as pltpu


def _round_up(x, m):
    return ((x + m - 1) // m) * m


# ----------------------------------------------------------------------------
# Kernel: grid = (num_dirs, num_time_chunks)
#   axis 0 ("parallel")  : direction (0 = forward, 1 = backward)
#   axis 1 ("arbitrary") : time chunk; hidden state carried in VMEM scratch
# ----------------------------------------------------------------------------
def gru_chunk_kernel(maxlen_ref, len_ref, xp_ref, whh_ref, bhn_ref,
                     out_ref, hlast_ref, h_scratch,
                     *, chunk, num_chunks, hidden, batch, unroll):
    H, B, Tt, C = hidden, batch, chunk, num_chunks
    d = pl.program_id(0)          # direction
    c = pl.program_id(1)          # chunk step (backward walks chunks in reverse)
    max_len = maxlen_ref[0]       # SMEM scalar

    # Absolute time chunk handled at this grid step; must match the index_maps.
    chunk_abs = c + d * (C - 1 - 2 * c)
    base_t = chunk_abs * Tt

    @pl.when(c == 0)              # fresh state at the start of each direction
    def _():
        h_scratch[...] = jnp.zeros((B, H), jnp.float32)

    @pl.when(base_t < max_len)    # at least one timestep of this chunk is live
    def _compute():
        lens = len_ref[...]                                            # (B,1) i32
        bhn = jnp.broadcast_to(bhn_ref[...].astype(jnp.float32), (B, H))  # hoisted
        wdt = whh_ref.dtype

        def step(s, h):
            # forward walks the chunk 0..Tt-1, backward walks it Tt-1..0
            local_t = s + d * (Tt - 1 - 2 * s)
            t_abs = base_t + local_t

            # gate-major (3, B, H) tile: lane-dense reads, no last-dim slicing
            xpt = xp_ref[local_t].astype(jnp.float32)
            h_c = h.astype(wdt)
            hw_r = jnp.dot(h_c, whh_ref[0], preferred_element_type=jnp.float32)
            hw_z = jnp.dot(h_c, whh_ref[1], preferred_element_type=jnp.float32)
            hw_n = jnp.dot(h_c, whh_ref[2], preferred_element_type=jnp.float32)

            r = jax.nn.sigmoid(xpt[0] + hw_r)
            z = jax.nn.sigmoid(xpt[1] + hw_z)
            n = jnp.tanh(xpt[2] + r * (hw_n + bhn))
            h_new = (1.0 - z) * n + z * h

            valid = lens > t_abs                               # (B,1) bool
            out_ref[local_t] = jnp.where(valid, h_new, 0.0)    # padded steps -> 0
            return jnp.where(valid, h_new, h)                  # freeze past length

        h_fin = lax.fori_loop(0, Tt, step, h_scratch[...], unroll=unroll)
        h_scratch[...] = h_fin

    @pl.when(base_t >= max_len)   # chunk entirely beyond every sequence
    def _skip():
        out_ref[...] = jnp.zeros((Tt, B, H), jnp.float32)

    hlast_ref[...] = h_scratch[...]   # resident block; final value written back


# ----------------------------------------------------------------------------
# One (optionally bidirectional) GRU layer.
# ----------------------------------------------------------------------------
def gru_layer_pallas(x, lengths, dir_params, *, time_chunk=None,
                     compute_dtype=jnp.float32):
    """x: (T, B, I) time-major f32; lengths: (B,) int.
    dir_params: list of (Wih (3H,I), Whh (3H,H), bih (3H,), bhh (3H,)),
    1 entry = unidirectional, 2 entries = [forward, backward]."""
    T, B, I = x.shape
    D = len(dir_params)
    H = dir_params[0][1].shape[1]

    # ---- hoisted input projection: ONE (T*B, I) x (I, D*3H) matmul for ALL
    #      directions (better MXU fill than per-direction GEMMs) --------------
    Wih_all = jnp.concatenate([p[0] for p in dir_params], axis=0)        # (D*3H, I)
    # r/z biases combine (bi+bh); n keeps only bi_n (bh_n multiplies r in-loop)
    b_all = jnp.concatenate(
        [jnp.concatenate([p[2][:2 * H] + p[3][:2 * H], p[2][2 * H:]]) for p in dir_params])
    xp_all = x.reshape(T * B, I) @ Wih_all.T + b_all                     # (T*B, D*3H)
    # gate-major layout (D, T, 3, B, H): per-step per-gate tiles are lane-dense
    xp = xp_all.reshape(T, B, D, 3, H).transpose(2, 0, 3, 1, 4).astype(compute_dtype)

    # recurrent weights per gate: h @ Whh_g.T  ->  store (H_in, H_out) tiles
    whh = jnp.stack([p[1].reshape(3, H, H).transpose(0, 2, 1) for p in dir_params],
                    axis=0).astype(compute_dtype)                        # (D, 3, H, H)
    bhn = jnp.stack([p[3][2 * H:].reshape(1, H) for p in dir_params], axis=0)  # (D,1,H)

    lengths = lengths.astype(jnp.int32)
    len_col = lengths.reshape(B, 1)                                      # (B,1) VMEM
    max_len = jnp.minimum(jnp.max(lengths), T).reshape(1)                # SMEM scalar

    # ---- time-chunk size: bound the VMEM working set (sized for v7x 64 MiB) --
    item = jnp.dtype(compute_dtype).itemsize
    pB, pH = _round_up(B, 8), _round_up(H, 128)        # padded VMEM tile dims
    bytes_per_t = 3 * pB * pH * item + pB * pH * 4     # xp + out, per timestep
    if time_chunk is None:
        time_chunk = max(1, min(T, (4 << 20) // bytes_per_t))
    Tt = int(time_chunk)
    T_pad = _round_up(T, Tt)
    if T_pad != T:                                     # padded steps are masked out
        xp = jnp.pad(xp, ((0, 0), (0, T_pad - T), (0, 0), (0, 0), (0, 0)))
    C = T_pad // Tt

    # double-buffered streamed blocks + weights + small refs, generous margin
    need = (4 * Tt * bytes_per_t + 2 * 3 * pH * pH * item
            + 6 * pB * pH * 4 + (2 << 20))
    vmem_limit = int(min(max(2 * need, 16 << 20), 48 << 20))

    def stream_map(d, c, ml):      # backward direction walks chunks in reverse
        cc = c + d * (C - 1 - 2 * c)
        return (d, cc, 0, 0, 0)

    def out_map(d, c, ml):
        cc = c + d * (C - 1 - 2 * c)
        return (d, cc, 0, 0)

    kernel = functools.partial(
        gru_chunk_kernel, chunk=Tt, num_chunks=C, hidden=H, batch=B,
        unroll=(Tt if Tt <= 8 else 2))

    out, hlast = pl.pallas_call(
        kernel,
        out_shape=(jax.ShapeDtypeStruct((D, T_pad, B, H), jnp.float32),
                   jax.ShapeDtypeStruct((D, B, H), jnp.float32)),
        grid_spec=pltpu.PrefetchScalarGridSpec(
            num_scalar_prefetch=1,                     # max_len -> SMEM
            grid=(D, C),
            in_specs=[
                pl.BlockSpec((B, 1), lambda d, c, ml: (0, 0)),                 # lengths
                pl.BlockSpec((None, Tt, 3, B, H), stream_map),                 # xp chunks
                pl.BlockSpec((None, 3, H, H), lambda d, c, ml: (d, 0, 0, 0)),  # Whh gates
                pl.BlockSpec((None, 1, H), lambda d, c, ml: (d, 0, 0)),        # b_hn
            ],
            out_specs=[
                pl.BlockSpec((None, Tt, B, H), out_map),                       # outputs
                pl.BlockSpec((None, B, H), lambda d, c, ml: (d, 0, 0)),        # final h
            ],
            scratch_shapes=[pltpu.VMEM((B, H), jnp.float32)],
        ),
        compiler_params=pltpu.CompilerParams(
            dimension_semantics=("parallel", "arbitrary"),   # dirs -> 2 TCs on v7x
            vmem_limit_bytes=vmem_limit),
    )(max_len, len_col, xp, whh, bhn)

    if D == 2:
        layer_out = jnp.concatenate([out[0, :T], out[1, :T]], axis=-1)   # (T, B, 2H)
        final = jnp.concatenate([hlast[0], hlast[1]], axis=-1)           # (B, 2H)
    else:
        layer_out, final = out[0, :T], hlast[0]
    return layer_out, final


# ----------------------------------------------------------------------------
# Encoder forward (GRU, bidirectional, num_layers) — mirrors Encoder.forward
# ----------------------------------------------------------------------------
def encoder_forward(x, lengths, params, *, bidirectional=True,
                    time_chunk=None, compute_dtype=jnp.float32):
    layer_input = x
    finals = []
    for layer_p in params:
        dirs = [layer_p['fwd'], layer_p['bwd']] if bidirectional else [layer_p['fwd']]
        layer_input, final = gru_layer_pallas(
            layer_input, lengths, dirs,
            time_chunk=time_chunk, compute_dtype=compute_dtype)
        finals.append(final)
    output = layer_input                                 # (T, B, output_size), padded zeros
    final_state = jnp.stack(finals, axis=0)              # (num_layers, B, output_size)
    return output, final_state


# ----------------------------------------------------------------------------
# Pure-JAX reference (same math, lax.scan) for correctness check.
# ----------------------------------------------------------------------------
def gru_direction_ref(x, lengths, Wih, Whh, bih, bhh, *, reverse):
    T, B, I = x.shape
    H = Whh.shape[1]
    Wir, Wiz, Win = Wih[:H], Wih[H:2 * H], Wih[2 * H:]
    Whr, Whz, Whn = Whh[:H], Whh[H:2 * H], Whh[2 * H:]
    bir, biz, bin_ = bih[:H], bih[H:2 * H], bih[2 * H:]
    bhr, bhz, bhn = bhh[:H], bhh[H:2 * H], bhh[2 * H:]

    def step(h, inp):
        xt, t = inp
        r = jax.nn.sigmoid(xt @ Wir.T + bir + h @ Whr.T + bhr)
        z = jax.nn.sigmoid(xt @ Wiz.T + biz + h @ Whz.T + bhz)
        n = jnp.tanh(xt @ Win.T + bin_ + r * (h @ Whn.T + bhn))
        h_new = (1.0 - z) * n + z * h
        valid = (lengths > t)[:, None]
        h_upd = jnp.where(valid, h_new, h)
        return h_upd, jnp.where(valid, h_new, 0.0)

    ts = jnp.arange(T)
    xs = (x[::-1], ts[::-1]) if reverse else (x, ts)
    h0 = jnp.zeros((B, H), jnp.float32)
    hT, outs = lax.scan(step, h0, xs)
    if reverse:
        outs = outs[::-1]
    return outs, hT


def encoder_forward_ref(x, lengths, params, *, bidirectional=True):
    layer_input = x
    finals = []
    for layer_p in params:
        out_f, h_f = gru_direction_ref(layer_input, lengths, *layer_p['fwd'], reverse=False)
        if bidirectional:
            out_b, h_b = gru_direction_ref(layer_input, lengths, *layer_p['bwd'], reverse=True)
            layer_input = jnp.concatenate([out_f, out_b], axis=-1)
            finals.append(jnp.concatenate([h_f, h_b], axis=-1))
        else:
            layer_input = out_f
            finals.append(h_f)
    return layer_input, jnp.stack(finals, axis=0)


# ----------------------------------------------------------------------------
# Deterministic parameter init (PyTorch GRU shapes: W_ih (3H,I), W_hh (3H,H), b (3H,))
# ----------------------------------------------------------------------------
def init_gru_params(key, input_size, hidden, num_layers, bidirectional):
    params = []
    bound = 1.0 / float(hidden) ** 0.5
    dirs = ['fwd', 'bwd'] if bidirectional else ['fwd']
    layer_in = input_size
    for _ in range(num_layers):
        layer_p = {}
        for name in dirs:
            key, k1, k2, k3, k4 = jax.random.split(key, 5)
            Wih = jax.random.uniform(k1, (3 * hidden, layer_in), jnp.float32, -bound, bound)
            Whh = jax.random.uniform(k2, (3 * hidden, hidden), jnp.float32, -bound, bound)
            bih = jax.random.uniform(k3, (3 * hidden,), jnp.float32, -bound, bound)
            bhh = jax.random.uniform(k4, (3 * hidden,), jnp.float32, -bound, bound)
            layer_p[name] = (Wih, Whh, bih, bhh)
        params.append(layer_p)
        layer_in = hidden * len(dirs)
    return params


if __name__ == "__main__":
    # Encoder('GRU', input_size=16, output_size=32, num_layers=2, bidirectional=True)
    T, B = 8, 4
    input_size, output_size, num_layers, bidirectional = 16, 32, 2, True
    cell_size = output_size // 2 if bidirectional else output_size   # 16

    key = jax.random.PRNGKey(0)
    key, kx = jax.random.split(key)
    x = jax.random.normal(kx, (T, B, input_size), jnp.float32)       # time-major
    lengths = jnp.array([8, 6, 5, 3], jnp.int32)                     # per-batch valid lengths

    params = init_gru_params(key, input_size, cell_size, num_layers, bidirectional)

    out_ref, final_ref = encoder_forward_ref(x, lengths, params, bidirectional=bidirectional)

    # --- f32 path, time_chunk=3 exercises chunk carry, chunk reversal, T padding
    output, final_state = encoder_forward(x, lengths, params, bidirectional=bidirectional,
                                          time_chunk=3, compute_dtype=jnp.float32)
    output = jax.block_until_ready(output)
    final_state = jax.block_until_ready(final_state)

    assert output.shape == (T, B, output_size)
    assert final_state.shape == (num_layers, B, output_size)
    assert jnp.allclose(output, out_ref, atol=1e-5, rtol=1e-5)
    assert jnp.allclose(final_state, final_ref, atol=1e-5, rtol=1e-5)

    # --- bf16 streamed xp / weights path (halved HBM traffic), looser tolerance
    output_bf, final_bf = encoder_forward(x, lengths, params, bidirectional=bidirectional,
                                          compute_dtype=jnp.bfloat16)
    output_bf = jax.block_until_ready(output_bf)
    final_bf = jax.block_until_ready(final_bf)
    assert jnp.allclose(output_bf, out_ref, atol=0.1, rtol=0.1)
    assert jnp.allclose(final_bf, final_ref, atol=0.1, rtol=0.1)

    print("KERNEL_OK")
</pallas_src>

<mosaic_0001>
module attributes {stable_mosaic.version = 11 : i64} {
  func.func @gru_chunk_kernel(%arg0: i32, %arg1: i32, %arg2: memref<1xi32, #tpu.memory_space<smem>>, %arg3: memref<4x1xi32, #tpu.memory_space<vmem>>, %arg4: memref<1x3x3x4x16xf32, #tpu.memory_space<vmem>>, %arg5: memref<1x3x16x16xf32, #tpu.memory_space<vmem>>, %arg6: memref<1x1x16xf32, #tpu.memory_space<vmem>>, %arg7: memref<1x3x4x16xf32, #tpu.memory_space<vmem>>, %arg8: memref<1x4x16xf32, #tpu.memory_space<vmem>>, %arg9: memref<4x16xf32, #tpu.memory_space<vmem>>) attributes {dimension_semantics = [#tpu.dimension_semantics<parallel>, #tpu.dimension_semantics<arbitrary>], iteration_bounds = array<i64: 2, 3>, scalar_prefetch = 1 : i64, scratch_operands = 1 : i64, tpu.core_type = #tpu.core_type<tc>, window_params = [{pipeline_mode = #tpu.pipeline_mode<synchronous>, transform_indices = @transform_0, window_bounds = array<i64: 4, 1>}, {transform_indices = @transform_1, window_bounds = array<i64: 1, 3, 3, 4, 16>}, {transform_indices = @transform_2, window_bounds = array<i64: 1, 3, 16, 16>}, {transform_indices = @transform_3, window_bounds = array<i64: 1, 1, 16>}, {transform_indices = @transform_4, window_bounds = array<i64: 1, 3, 4, 16>}, {transform_indices = @transform_5, window_bounds = array<i64: 1, 4, 16>}]} {
    %c0 = arith.constant 0 : index
    %0 = memref.load %arg2[%c0] : memref<1xi32, #tpu.memory_space<smem>>
    %c2_i32 = arith.constant 2 : i32
    %1 = arith.muli %c2_i32, %arg1 : i32
    %c2_i32_0 = arith.constant 2 : i32
    %2 = arith.subi %c2_i32_0, %1 : i32
    %3 = arith.muli %arg0, %2 : i32
    %4 = arith.addi %arg1, %3 : i32
    %c3_i32 = arith.constant 3 : i32
    %5 = arith.muli %4, %c3_i32 : i32
    %c0_i32 = arith.constant 0 : i32
    %6 = arith.cmpi eq, %arg1, %c0_i32 : i32
    %7 = arith.extui %6 : i1 to i32
    %c0_i32_1 = arith.constant 0 : i32
    %8 = arith.cmpi ne, %7, %c0_i32_1 : i32
    scf.if %8 {
      %cst = arith.constant 0.000000e+00 : f32
      %19 = vector.broadcast %cst : f32 to vector<4x16xf32>
      %c0_9 = arith.constant 0 : index
      %c0_10 = arith.constant 0 : index
      %20 = vector.load %arg9[%c0_9, %c0_10] : memref<4x16xf32, #tpu.memory_space<vmem>>, vector<4x16xf32>
      tpu.vector_store %arg9[%c0_9, %c0_10], %19 {strides = array<i32>} : memref<4x16xf32, #tpu.memory_space<vmem>>, vector<4x16xf32>,
    } else {
    }
    %9 = arith.cmpi slt, %5, %0 : i32
    %10 = arith.extui %9 : i1 to i32
    %c0_i32_2 = arith.constant 0 : i32
    %11 = arith.cmpi ne, %10, %c0_i32_2 : i32
    scf.if %11 {
      %c0_9 = arith.constant 0 : index
      %c0_10 = arith.constant 0 : index
      %19 = vector.load %arg3[%c0_9, %c0_10] : memref<4x1xi32, #tpu.memory_space<vmem>>, vector<4x1xi32>
      %c0_11 = arith.constant 0 : index
      %c0_12 = arith.constant 0 : index
      %c0_13 = arith.constant 0 : index
      %20 = vector.load %arg6[%c0_11, %c0_12, %c0_13] : memref<1x1x16xf32, #tpu.memory_space<vmem>>, vector<1x1x16xf32>
      %21 = vector.shape_cast %20 : vector<1x1x16xf32> to vector<1x16xf32>
      %22 = vector.shape_cast %21 : vector<1x16xf32> to vector<1x16xf32>
      %23 = vector.broadcast %22 : vector<1x16xf32> to vector<4x16xf32>
      %c0_14 = arith.constant 0 : index
      %c0_15 = arith.constant 0 : index
      %24 = vector.load %arg9[%c0_14, %c0_15] : memref<4x16xf32, #tpu.memory_space<vmem>>, vector<4x16xf32>
      %c0_i32_16 = arith.constant 0 : i32
      %c2_i32_17 = arith.constant 2 : i32
      %25 = arith.muli %c2_i32_17, %c0_i32_16 : i32
      %c2_i32_18 = arith.constant 2 : i32
      %26 = arith.subi %c2_i32_18, %25 : i32
      %27 = arith.muli %arg0, %26 : i32
      %28 = arith.addi %c0_i32_16, %27 : i32
      %29 = arith.addi %5, %28 : i32
      %c0_19 = arith.constant 0 : index
      %30 = arith.index_cast %28 : i32 to index
      %c0_20 = arith.constant 0 : index
      %c0_21 = arith.constant 0 : index
      %c0_22 = arith.constant 0 : index
      %31 = vector.load %arg4[%c0_19, %30, %c0_20, %c0_21, %c0_22] : memref<1x3x3x4x16xf32, #tpu.memory_space<vmem>>, vector<1x1x3x4x16xf32>
      %32 = vector.shape_cast %31 : vector<1x1x3x4x16xf32> to vector<3x4x16xf32>
      %c0_23 = arith.constant 0 : index
      %c0_24 = arith.constant 0 : index
      %c0_25 = arith.constant 0 : index
      %c0_26 = arith.constant 0 : index
      %33 = vector.load %arg5[%c0_23, %c0_24, %c0_25, %c0_26] : memref<1x3x16x16xf32, #tpu.memory_space<vmem>>, vector<1x1x16x16xf32>
      %34 = vector.shape_cast %33 : vector<1x1x16x16xf32> to vector<16x16xf32>
      %cst = arith.constant dense<0.000000e+00> : vector<4x16xf32>
      %35 = tpu.matmul %24, %34, %cst {dimension_numbers = #tpu.dot_dimension_numbers<[1], [0], [0], [1], [0, 0, 1, 1], [], []>} : vector<4x16xf32>, vector<16x16xf32>, vector<4x16xf32> -> vector<4x16xf32>
      %c0_27 = arith.constant 0 : index
      %c1 = arith.constant 1 : index
      %c0_28 = arith.constant 0 : index
      %c0_29 = arith.constant 0 : index
      %36 = vector.load %arg5[%c0_27, %c1, %c0_28, %c0_29] : memref<1x3x16x16xf32, #tpu.memory_space<vmem>>, vector<1x1x16x16xf32>
      %37 = vector.shape_cast %36 : vector<1x1x16x16xf32> to vector<16x16xf32>
      %cst_30 = arith.constant dense<0.000000e+00> : vector<4x16xf32>
      %38 = tpu.matmul %24, %37, %cst_30 {dimension_numbers = #tpu.dot_dimension_numbers<[1], [0], [0], [1], [0, 0, 1, 1], [], []>} : vector<4x16xf32>, vector<16x16xf32>, vector<4x16xf32> -> vector<4x16xf32>
      %c0_31 = arith.constant 0 : index
      %c2 = arith.constant 2 : index
      %c0_32 = arith.constant 0 : index
      %c0_33 = arith.constant 0 : index
      %39 = vector.load %arg5[%c0_31, %c2, %c0_32, %c0_33] : memref<1x3x16x16xf32, #tpu.memory_space<vmem>>, vector<1x1x16x16xf32>
      %40 = vector.shape_cast %39 : vector<1x1x16x16xf32> to vector<16x16xf32>
      %cst_34 = arith.constant dense<0.000000e+00> : vector<4x16xf32>
      %41 = tpu.matmul %24, %40, %cst_34 {dimension_numbers = #tpu.dot_dimension_numbers<[1], [0], [0], [1], [0, 0, 1, 1], [], []>} : vector<4x16xf32>, vector<16x16xf32>, vector<4x16xf32> -> vector<4x16xf32>
      %42 = vector.extract_strided_slice %32 {offsets = [0, 0, 0], sizes = [1, 4, 16], strides = [1, 1, 1]} : vector<3x4x16xf32> to vector<1x4x16xf32>
      %43 = vector.shape_cast %42 : vector<1x4x16xf32> to vector<4x16xf32>
      %44 = arith.addf %43, %35 : vector<4x16xf32>
      %45 = arith.negf %44 : vector<4x16xf32>
      %46 = math.exp %45 : vector<4x16xf32>
      %cst_35 = arith.constant 1.000000e+00 : f32
      %47 = vector.broadcast %cst_35 : f32 to vector<4x16xf32>
      %48 = arith.addf %47, %46 : vector<4x16xf32>
      %49 = arith.divf %47, %48 : vector<4x16xf32>
      %50 = vector.extract_strided_slice %32 {offsets = [1, 0, 0], sizes = [1, 4, 16], strides = [1, 1, 1]} : vector<3x4x16xf32> to vector<1x4x16xf32>
      %51 = vector.shape_cast %50 : vector<1x4x16xf32> to vector<4x16xf32>
      %52 = arith.addf %51, %38 : vector<4x16xf32>
      %53 = arith.negf %52 : vector<4x16xf32>
      %54 = math.exp %53 : vector<4x16xf32>
      %cst_36 = arith.constant 1.000000e+00 : f32
      %55 = vector.broadcast %cst_36 : f32 to vector<4x16xf32>
      %56 = arith.addf %55, %54 : vector<4x16xf32>
      %57 = arith.divf %55, %56 : vector<4x16xf32>
      %58 = vector.extract_strided_slice %32 {offsets = [2, 0, 0], sizes = [1, 4, 16], strides = [1, 1, 1]} : vector<3x4x16xf32> to vector<1x4x16xf32>
      %59 = vector.shape_cast %58 : vector<1x4x16xf32> to vector<4x16xf32>
      %60 = arith.addf %41, %23 : vector<4x16xf32>
      %61 = arith.mulf %49, %60 : vector<4x16xf32>
      %62 = arith.addf %59, %61 : vector<4x16xf32>
      %63 = math.tanh %62 : vector<4x16xf32>
      %cst_37 = arith.constant 1.000000e+00 : f32
      %64 = vector.broadcast %cst_37 : f32 to vector<4x16xf32>
      %65 = arith.subf %64, %57 : vector<4x16xf32>
      %66 = arith.mulf %65, %63 : vector<4x16xf32>
      %67 = arith.mulf %57, %24 : vector<4x16xf32>
      %68 = arith.addf %66, %67 : vector<4x16xf32>
      %69 = vector.broadcast %29 : i32 to vector<4x1xi32>
      %70 = arith.cmpi sgt, %19, %69 : vector<4x1xi32>
      %cst_38 = arith.constant 0.000000e+00 : f32
      %71 = vector.shape_cast %70 : vector<4x1xi1> to vector<4x1xi1>
      %72 = vector.broadcast %71 : vector<4x1xi1> to vector<4x16xi1>
      %73 = vector.broadcast %cst_38 : f32 to vector<4x16xf32>
      %74 = arith.select %72, %68, %73 : vector<4x16xi1>, vector<4x16xf32>
      %c0_39 = arith.constant 0 : index
      %75 = arith.index_cast %28 : i32 to index
      %c0_40 = arith.constant 0 : index
      %c0_41 = arith.constant 0 : index
      %76 = vector.load %arg7[%c0_39, %75, %c0_40, %c0_41] : memref<1x3x4x16xf32, #tpu.memory_space<vmem>>, vector<1x1x4x16xf32>
      %77 = vector.shape_cast %76 : vector<1x1x4x16xf32> to vector<4x16xf32>
      %78 = vector.shape_cast %74 : vector<4x16xf32> to vector<1x1x4x16xf32>
      tpu.vector_store %arg7[%c0_39, %75, %c0_40, %c0_41], %78 {strides = array<i32>} : memref<1x3x4x16xf32, #tpu.memory_space<vmem>>, vector<1x1x4x16xf32>,
      %79 = vector.shape_cast %70 : vector<4x1xi1> to vector<4x1xi1>
      %80 = vector.broadcast %79 : vector<4x1xi1> to vector<4x16xi1>
      %81 = arith.select %80, %68, %24 : vector<4x16xi1>, vector<4x16xf32>
      %c1_i32 = arith.constant 1 : i32
      %c2_i32_42 = arith.constant 2 : i32
      %82 = arith.muli %c2_i32_42, %c1_i32 : i32
      %c2_i32_43 = arith.constant 2 : i32
      %83 = arith.subi %c2_i32_43, %82 : i32
      %84 = arith.muli %arg0, %83 : i32
      %85 = arith.addi %c1_i32, %84 : i32
      %86 = arith.addi %5, %85 : i32
      %c0_44 = arith.constant 0 : index
      %87 = arith.index_cast %85 : i32 to index
      %c0_45 = arith.constant 0 : index
      %c0_46 = arith.constant 0 : index
      %c0_47 = arith.constant 0 : index
      %88 = vector.load %arg4[%c0_44, %87, %c0_45, %c0_46, %c0_47] : memref<1x3x3x4x16xf32, #tpu.memory_space<vmem>>, vector<1x1x3x4x16xf32>
      %89 = vector.shape_cast %88 : vector<1x1x3x4x16xf32> to vector<3x4x16xf32>
      %c0_48 = arith.constant 0 : index
      %c0_49 = arith.constant 0 : index
      %c0_50 = arith.constant 0 : index
      %c0_51 = arith.constant 0 : index
      %90 = vector.load %arg5[%c0_48, %c0_49, %c0_50, %c0_51] : memref<1x3x16x16xf32, #tpu.memory_space<vmem>>, vector<1x1x16x16xf32>
      %91 = vector.shape_cast %90 : vector<1x1x16x16xf32> to vector<16x16xf32>
      %cst_52 = arith.constant dense<0.000000e+00> : vector<4x16xf32>
      %92 = tpu.matmul %81, %91, %cst_52 {dimension_numbers = #tpu.dot_dimension_numbers<[1], [0], [0], [1], [0, 0, 1, 1], [], []>} : vector<4x16xf32>, vector<16x16xf32>, vector<4x16xf32> -> vector<4x16xf32>
      %c0_53 = arith.constant 0 : index
      %c1_54 = arith.constant 1 : index
      %c0_55 = arith.constant 0 : index
      %c0_56 = arith.constant 0 : index
      %93 = vector.load %arg5[%c0_53, %c1_54, %c0_55, %c0_56] : memref<1x3x16x16xf32, #tpu.memory_space<vmem>>, vector<1x1x16x16xf32>
      %94 = vector.shape_cast %93 : vector<1x1x16x16xf32> to vector<16x16xf32>
      %cst_57 = arith.constant dense<0.000000e+00> : vector<4x16xf32>
      %95 = tpu.matmul %81, %94, %cst_57 {dimension_numbers = #tpu.dot_dimension_numbers<[1], [0], [0], [1], [0, 0, 1, 1], [], []>} : vector<4x16xf32>, vector<16x16xf32>, vector<4x16xf32> -> vector<4x16xf32>
      %c0_58 = arith.constant 0 : index
      %c2_59 = arith.constant 2 : index
      %c0_60 = arith.constant 0 : index
      %c0_61 = arith.constant 0 : index
      %96 = vector.load %arg5[%c0_58, %c2_59, %c0_60, %c0_61] : memref<1x3x16x16xf32, #tpu.memory_space<vmem>>, vector<1x1x16x16xf32>
      %97 = vector.shape_cast %96 : vector<1x1x16x16xf32> to vector<16x16xf32>
      %cst_62 = arith.constant dense<0.000000e+00> : vector<4x16xf32>
      %98 = tpu.matmul %81, %97, %cst_62 {dimension_numbers = #tpu.dot_dimension_numbers<[1], [0], [0], [1], [0, 0, 1, 1], [], []>} : vector<4x16xf32>, vector<16x16xf32>, vector<4x16xf32> -> vector<4x16xf32>
      %99 = vector.extract_strided_slice %89 {offsets = [0, 0, 0], sizes = [1, 4, 16], strides = [1, 1, 1]} : vector<3x4x16xf32> to vector<1x4x16xf32>
      %100 = vector.shape_cast %99 : vector<1x4x16xf32> to vector<4x16xf32>
      %101 = arith.addf %100, %92 : vector<4x16xf32>
      %102 = arith.negf %101 : vector<4x16xf32>
      %103 = math.exp %102 : vector<4x16xf32>
      %cst_63 = arith.constant 1.000000e+00 : f32
      %104 = vector.broadcast %cst_63 : f32 to vector<4x16xf32>
      %105 = arith.addf %104, %103 : vector<4x16xf32>
      %106 = arith.divf %104, %105 : vector<4x16xf32>
      %107 = vector.extract_strided_slice %89 {offsets = [1, 0, 0], sizes = [1, 4, 16], strides = [1, 1, 1]} : vector<3x4x16xf32> to vector<1x4x16xf32>
      %108 = vector.shape_cast %107 : vector<1x4x16xf32> to vector<4x16xf32>
      %109 = arith.addf %108, %95 : vector<4x16xf32>
      %110 = arith.negf %109 : vector<4x16xf32>
      %111 = math.exp %110 : vector<4x16xf32>
      %cst_64 = arith.constant 1.000000e+00 : f32
      %112 = vector.broadcast %cst_64 : f32 to vector<4x16xf32>
      %113 = arith.addf %112, %111 : vector<4x16xf32>
      %114 = arith.divf %112, %113 : vector<4x16xf32>
      %115 = vector.extract_strided_slice %89 {offsets = [2, 0, 0], sizes = [1, 4, 16], strides = [1, 1, 1]} : vector<3x4x16xf32> to vector<1x4x16xf32>
      %116 = vector.shape_cast %115 : vector<1x4x16xf32> to vector<4x16xf32>
      %117 = arith.addf %98, %23 : vector<4x16xf32>
      %118 = arith.mulf %106, %117 : vector<4x16xf32>
      %119 = arith.addf %116, %118 : vector<4x16xf32>
      %120 = math.tanh %119 : vector<4x16xf32>
      %cst_65 = arith.constant 1.000000e+00 : f32
      %121 = vector.broadcast %cst_65 : f32 to vector<4x16xf32>
      %122 = arith.subf %121, %114 : vector<4x16xf32>
      %123 = arith.mulf %122, %120 : vector<4x16xf32>
      %124 = arith.mulf %114, %81 : vector<4x16xf32>
      %125 = arith.addf %123, %124 : vector<4x16xf32>
      %126 = vector.broadcast %86 : i32 to vector<4x1xi32>
      %127 = arith.cmpi sgt, %19, %126 : vector<4x1xi32>
      %cst_66 = arith.constant 0.000000e+00 : f32
      %128 = vector.shape_cast %127 : vector<4x1xi1> to vector<4x1xi1>
      %129 = vector.broadcast %128 : vector<4x1xi1> to vector<4x16xi1>
      %130 = vector.broadcast %cst_66 : f32 to vector<4x16xf32>
      %131 = arith.select %129, %125, %130 : vector<4x16xi1>, vector<4x16xf32>
      %c0_67 = arith.constant 0 : index
      %132 = arith.index_cast %85 : i32 to index
      %c0_68 = arith.constant 0 : index
      %c0_69 = arith.constant 0 : index
      %133 = vector.load %arg7[%c0_67, %132, %c0_68, %c0_69] : memref<1x3x4x16xf32, #tpu.memory_space<vmem>>, vector<1x1x4x16xf32>
      %134 = vector.shape_cast %133 : vector<1x1x4x16xf32> to vector<4x16xf32>
      %135 = vector.shape_cast %131 : vector<4x16xf32> to vector<1x1x4x16xf32>
      tpu.vector_store %arg7[%c0_67, %132, %c0_68, %c0_69], %135 {strides = array<i32>} : memref<1x3x4x16xf32, #tpu.memory_space<vmem>>, vector<1x1x4x16xf32>,
      %136 = vector.shape_cast %127 : vector<4x1xi1> to vector<4x1xi1>
      %137 = vector.broadcast %136 : vector<4x1xi1> to vector<4x16xi1>
      %138 = arith.select %137, %125, %81 : vector<4x16xi1>, vector<4x16xf32>
      %c2_i32_70 = arith.constant 2 : i32
      %c2_i32_71 = arith.constant 2 : i32
      %139 = arith.muli %c2_i32_71, %c2_i32_70 : i32
      %c2_i32_72 = arith.constant 2 : i32
      %140 = arith.subi %c2_i32_72, %139 : i32
      %141 = arith.muli %arg0, %140 : i32
      %142 = arith.addi %c2_i32_70, %141 : i32
      %143 = arith.addi %5, %142 : i32
      %c0_73 = arith.constant 0 : index
      %144 = arith.index_cast %142 : i32 to index
      %c0_74 = arith.constant 0 : index
      %c0_75 = arith.constant 0 : index
      %c0_76 = arith.constant 0 : index
      %145 = vector.load %arg4[%c0_73, %144, %c0_74, %c0_75, %c0_76] : memref<1x3x3x4x16xf32, #tpu.memory_space<vmem>>, vector<1x1x3x4x16xf32>
      %146 = vector.shape_cast %145 : vector<1x1x3x4x16xf32> to vector<3x4x16xf32>
      %c0_77 = arith.constant 0 : index
      %c0_78 = arith.constant 0 : index
      %c0_79 = arith.constant 0 : index
      %c0_80 = arith.constant 0 : index
      %147 = vector.load %arg5[%c0_77, %c0_78, %c0_79, %c0_80] : memref<1x3x16x16xf32, #tpu.memory_space<vmem>>, vector<1x1x16x16xf32>
      %148 = vector.shape_cast %147 : vector<1x1x16x16xf32> to vector<16x16xf32>
      %cst_81 = arith.constant dense<0.000000e+00> : vector<4x16xf32>
      %149 = tpu.matmul %138, %148, %cst_81 {dimension_numbers = #tpu.dot_dimension_numbers<[1], [0], [0], [1], [0, 0, 1, 1], [], []>} : vector<4x16xf32>, vector<16x16xf32>, vector<4x16xf32> -> vector<4x16xf32>
      %c0_82 = arith.constant 0 : index
      %c1_83 = arith.constant 1 : index
      %c0_84 = arith.constant 0 : index
      %c0_85 = arith.constant 0 : index
      %150 = vector.load %arg5[%c0_82, %c1_83, %c0_84, %c0_85] : memref<1x3x16x16xf32, #tpu.memory_space<vmem>>, vector<1x1x16x16xf32>
      %151 = vector.shape_cast %150 : vector<1x1x16x16xf32> to vector<16x16xf32>
      %cst_86 = arith.constant dense<0.000000e+00> : vector<4x16xf32>
      %152 = tpu.matmul %138, %151, %cst_86 {dimension_numbers = #tpu.dot_dimension_numbers<[1], [0], [0], [1], [0, 0, 1, 1], [], []>} : vector<4x16xf32>, vector<16x16xf32>, vector<4x16xf32> -> vector<4x16xf32>
      %c0_87 = arith.constant 0 : index
      %c2_88 = arith.constant 2 : index
      %c0_89 = arith.constant 0 : index
      %c0_90 = arith.constant 0 : index
      %153 = vector.load %arg5[%c0_87, %c2_88, %c0_89, %c0_90] : memref<1x3x16x16xf32, #tpu.memory_space<vmem>>, vector<1x1x16x16xf32>
      %154 = vector.shape_cast %153 : vector<1x1x16x16xf32> to vector<16x16xf32>
      %cst_91 = arith.constant dense<0.000000e+00> : vector<4x16xf32>
      %155 = tpu.matmul %138, %154, %cst_91 {dimension_numbers = #tpu.dot_dimension_numbers<[1], [0], [0], [1], [0, 0, 1, 1], [], []>} : vector<4x16xf32>, vector<16x16xf32>, vector<4x16xf32> -> vector<4x16xf32>
      %156 = vector.extract_strided_slice %146 {offsets = [0, 0, 0], sizes = [1, 4, 16], strides = [1, 1, 1]} : vector<3x4x16xf32> to vector<1x4x16xf32>
      %157 = vector.shape_cast %156 : vector<1x4x16xf32> to vector<4x16xf32>
      %158 = arith.addf %157, %149 : vector<4x16xf32>
      %159 = arith.negf %158 : vector<4x16xf32>
      %160 = math.exp %159 : vector<4x16xf32>
      %cst_92 = arith.constant 1.000000e+00 : f32
      %161 = vector.broadcast %cst_92 : f32 to vector<4x16xf32>
      %162 = arith.addf %161, %160 : vector<4x16xf32>
      %163 = arith.divf %161, %162 : vector<4x16xf32>
      %164 = vector.extract_strided_slice %146 {offsets = [1, 0, 0], sizes = [1, 4, 16], strides = [1, 1, 1]} : vector<3x4x16xf32> to vector<1x4x16xf32>
      %165 = vector.shape_cast %164 : vector<1x4x16xf32> to vector<4x16xf32>
      %166 = arith.addf %165, %152 : vector<4x16xf32>
      %167 = arith.negf %166 : vector<4x16xf32>
      %168 = math.exp %167 : vector<4x16xf32>
      %cst_93 = arith.constant 1.000000e+00 : f32
      %169 = vector.broadcast %cst_93 : f32 to vector<4x16xf32>
      %170 = arith.addf %169, %168 : vector<4x16xf32>
      %171 = arith.divf %169, %170 : vector<4x16xf32>
      %172 = vector.extract_strided_slice %146 {offsets = [2, 0, 0], sizes = [1, 4, 16], strides = [1, 1, 1]} : vector<3x4x16xf32> to vector<1x4x16xf32>
      %173 = vector.shape_cast %172 : vector<1x4x16xf32> to vector<4x16xf32>
      %174 = arith.addf %155, %23 : vector<4x16xf32>
      %175 = arith.mulf %163, %174 : vector<4x16xf32>
      %176 = arith.addf %173, %175 : vector<4x16xf32>
      %177 = math.tanh %176 : vector<4x16xf32>
      %cst_94 = arith.constant 1.000000e+00 : f32
      %178 = vector.broadcast %cst_94 : f32 to vector<4x16xf32>
      %179 = arith.subf %178, %171 : vector<4x16xf32>
      %180 = arith.mulf %179, %177 : vector<4x16xf32>
      %181 = arith.mulf %171, %138 : vector<4x16xf32>
      %182 = arith.addf %180, %181 : vector<4x16xf32>
      %183 = vector.broadcast %143 : i32 to vector<4x1xi32>
      %184 = arith.cmpi sgt, %19, %183 : vector<4x1xi32>
      %cst_95 = arith.constant 0.000000e+00 : f32
      %185 = vector.shape_cast %184 : vector<4x1xi1> to vector<4x1xi1>
      %186 = vector.broadcast %185 : vector<4x1xi1> to vector<4x16xi1>
      %187 = vector.broadcast %cst_95 : f32 to vector<4x16xf32>
      %188 = arith.select %186, %182, %187 : vector<4x16xi1>, vector<4x16xf32>
      %c0_96 = arith.constant 0 : index
      %189 = arith.index_cast %142 : i32 to index
      %c0_97 = arith.constant 0 : index
      %c0_98 = arith.constant 0 : index
      %190 = vector.load %arg7[%c0_96, %189, %c0_97, %c0_98] : memref<1x3x4x16xf32, #tpu.memory_space<vmem>>, vector<1x1x4x16xf32>
      %191 = vector.shape_cast %190 : vector<1x1x4x16xf32> to vector<4x16xf32>
      %192 = vector.shape_cast %188 : vector<4x16xf32> to vector<1x1x4x16xf32>
      tpu.vector_store %arg7[%c0_96, %189, %c0_97, %c0_98], %192 {strides = array<i32>} : memref<1x3x4x16xf32, #tpu.memory_space<vmem>>, vector<1x1x4x16xf32>,
      %193 = vector.shape_cast %184 : vector<4x1xi1> to vector<4x1xi1>
      %194 = vector.broadcast %193 : vector<4x1xi1> to vector<4x16xi1>
      %195 = arith.select %194, %182, %138 : vector<4x16xi1>, vector<4x16xf32>
      %c3_i32_99 = arith.constant 3 : i32
      %c0_100 = arith.constant 0 : index
      %c0_101 = arith.constant 0 : index
      %196 = vector.load %arg9[%c0_100, %c0_101] : memref<4x16xf32, #tpu.memory_space<vmem>>, vector<4x16xf32>
      tpu.vector_store %arg9[%c0_100, %c0_101], %195 {strides = array<i32>} : memref<4x16xf32, #tpu.memory_space<vmem>>, vector<4x16xf32>,
    } else {
    }
    %12 = arith.cmpi sge, %5, %0 : i32
    %13 = arith.extui %12 : i1 to i32
    %c0_i32_3 = arith.constant 0 : i32
    %14 = arith.cmpi ne, %13, %c0_i32_3 : i32
    scf.if %14 {
      %cst = arith.constant 0.000000e+00 : f32
      %19 = vector.broadcast %cst : f32 to vector<3x4x16xf32>
      %c0_9 = arith.constant 0 : index
      %c0_10 = arith.constant 0 : index
      %c0_11 = arith.constant 0 : index
      %c0_12 = arith.constant 0 : index
      %20 = vector.load %arg7[%c0_9, %c0_10, %c0_11, %c0_12] : memref<1x3x4x16xf32, #tpu.memory_space<vmem>>, vector<1x3x4x16xf32>
      %21 = vector.shape_cast %20 : vector<1x3x4x16xf32> to vector<3x4x16xf32>
      %22 = vector.shape_cast %19 : vector<3x4x16xf32> to vector<1x3x4x16xf32>
      tpu.vector_store %arg7[%c0_9, %c0_10, %c0_11, %c0_12], %22 {strides = array<i32>} : memref<1x3x4x16xf32, #tpu.memory_space<vmem>>, vector<1x3x4x16xf32>,
    } else {
    }
    %c0_4 = arith.constant 0 : index
    %c0_5 = arith.constant 0 : index
    %15 = vector.load %arg9[%c0_4, %c0_5] : memref<4x16xf32, #tpu.memory_space<vmem>>, vector<4x16xf32>
    %c0_6 = arith.constant 0 : index
    %c0_7 = arith.constant 0 : index
    %c0_8 = arith.constant 0 : index
    %16 = vector.load %arg8[%c0_6, %c0_7, %c0_8] : memref<1x4x16xf32, #tpu.memory_space<vmem>>, vector<1x4x16xf32>
    %17 = vector.shape_cast %16 : vector<1x4x16xf32> to vector<4x16xf32>
    %18 = vector.shape_cast %15 : vector<4x16xf32> to vector<1x4x16xf32>
    tpu.vector_store %arg8[%c0_6, %c0_7, %c0_8], %18 {strides = array<i32>} : memref<1x4x16xf32, #tpu.memory_space<vmem>>, vector<1x4x16xf32>,
    return
  }
  func.func @transform_0(%arg0: i32, %arg1: i32, %arg2: memref<1xi32, #tpu.memory_space<smem>>) -> (i32, i32) {
    %c0_i32 = arith.constant 0 : i32
    %c0_i32_0 = arith.constant 0 : i32
    %c0_i32_1 = arith.constant 0 : i32
    return %c0_i32, %c0_i32_0 : i32, i32
  }
  func.func @transform_1(%arg0: i32, %arg1: i32, %arg2: memref<1xi32, #tpu.memory_space<smem>>) -> (i32, i32, i32, i32, i32) {
    %c2_i32 = arith.constant 2 : i32
    %0 = arith.muli %c2_i32, %arg1 : i32
    %c2_i32_0 = arith.constant 2 : i32
    %1 = arith.subi %c2_i32_0, %0 : i32
    %2 = arith.muli %arg0, %1 : i32
    %3 = arith.addi %arg1, %2 : i32
    %c0_i32 = arith.constant 0 : i32
    %c0_i32_1 = arith.constant 0 : i32
    %c0_i32_2 = arith.constant 0 : i32
    %c0_i32_3 = arith.constant 0 : i32
    return %arg0, %3, %c0_i32, %c0_i32_1, %c0_i32_2 : i32, i32, i32, i32, i32
  }
  func.func @transform_2(%arg0: i32, %arg1: i32, %arg2: memref<1xi32, #tpu.memory_space<smem>>) -> (i32, i32, i32, i32) {
    %c0_i32 = arith.constant 0 : i32
    %c0_i32_0 = arith.constant 0 : i32
    %c0_i32_1 = arith.constant 0 : i32
    %c0_i32_2 = arith.constant 0 : i32
    return %arg0, %c0_i32, %c0_i32_0, %c0_i32_1 : i32, i32, i32, i32
  }
  func.func @transform_3(%arg0: i32, %arg1: i32, %arg2: memref<1xi32, #tpu.memory_space<smem>>) -> (i32, i32, i32) {
    %c0_i32 = arith.constant 0 : i32
    %c0_i32_0 = arith.constant 0 : i32
    %c0_i32_1 = arith.constant 0 : i32
    return %arg0, %c0_i32, %c0_i32_0 : i32, i32, i32
  }
  func.func @transform_4(%arg0: i32, %arg1: i32, %arg2: memref<1xi32, #tpu.memory_space<smem>>) -> (i32, i32, i32, i32) {
    %c2_i32 = arith.constant 2 : i32
    %0 = arith.muli %c2_i32, %arg1 : i32
    %c2_i32_0 = arith.constant 2 : i32
    %1 = arith.subi %c2_i32_0, %0 : i32
    %2 = arith.muli %arg0, %1 : i32
    %3 = arith.addi %arg1, %2 : i32
    %c0_i32 = arith.constant 0 : i32
    %c0_i32_1 = arith.constant 0 : i32
    %c0_i32_2 = arith.constant 0 : i32
    return %arg0, %3, %c0_i32, %c0_i32_1 : i32, i32, i32, i32
  }
  func.func @transform_5(%arg0: i32, %arg1: i32, %arg2: memref<1xi32, #tpu.memory_space<smem>>) -> (i32, i32, i32) {
    %c0_i32 = arith.constant 0 : i32
    %c0_i32_0 = arith.constant 0 : i32
    %c0_i32_1 = arith.constant 0 : i32
    return %arg0, %c0_i32, %c0_i32_0 : i32, i32, i32
  }
}

</mosaic_0001>

<bundles_post_ra>
// kernel: tpu_custom_call.1
= control target key start
LH: loop header
LB: loop body
LE: loop exit
PB: predicated region body
PF: predicated region fallthrough
CT: control target
= control target key end

     0   :  { %s2526_s0 = inlined_call_operand.<no memory space> [shape: s32[1], index: 0, kind: input, shape index: {}]   ;;  %s2527_s1 = inlined_call_operand.vmem [shape: s32[4,1], index: 1, kind: input, shape index: {}]   ;;  %s2528_s2 = inlined_call_operand.hbm [shape: f32[2,9,3,4,16], index: 2, kind: input, shape index: {}]   ;;  %s2529_s3 = inlined_call_operand.hbm [shape: f32[2,3,16,16], index: 3, kind: input, shape index: {}]   ;;  %s2530_s4 = inlined_call_operand.vmem [shape: f32[2,1,16], index: 4, kind: input, shape index: {}]   ;;  %s2531_s5 = inlined_call_operand.hbm [shape: f32[2,9,4,16], index: 5, kind: output, shape index: {0}]   ;;  %s2532_s6 = inlined_call_operand.hbm [shape: f32[2,4,16], index: 6, kind: output, shape index: {1}]  }
   0x1   :  { %2551 = sst [smem:[#allocation25_spill]] %s2527_s1 }
   0x2   :  { %2552 = sst [smem:[#allocation26_spill]] %s2528_s2 }
   0x3   :  { %2553 = sst [smem:[#allocation27_spill]] %s2529_s3 }
   0x4   :  { %2554 = sst [smem:[#allocation28_spill]] %s2531_s5 }
   0x5   :  { %2555 = sst [smem:[#allocation29_spill]] %s2532_s6 }
   0x6   :  { %12 = sst [smem:[#allocation4]] %s2526_s0 }
   0x7   :  { %13 = vsyncpa [#allocation6], 0 }
   0x8   :  { %15 = vsyncpa [#allocation6 + $0x1], 0 }
   0x9   :  { %16 = vsyncpa [#allocation9], 0 }
   0xa   :  { %18 = vsyncpa [#allocation9 + $0x1], 0 }
   0xb   :  { %19 = vsyncpa [#allocation7], 0 }
   0xc   :  { %21 = vsyncpa [#allocation7 + $0x1], 0 }
   0xd   :  { %22 = vsyncpa [#allocation12], 0 }
   0xe   :  { %24 = vsyncpa [#allocation12 + $0x1], 0  ;;  %s2003_s23 = smov 0   ;;  %s2005_s24 = smov 0  }
   0xf   :  { %s2007_s25 = smov 0   ;;  %s2009_s26 = smov 0  }
  0x10   :  { %s2011_s27 = smov 0   ;;  %s2013_s28 = smov 0  }
  0x11   :  { %s2015_s0 = smov 0   ;;  %s2017_s29 = smov 0  }
  0x12   :  { %s2019_s30 = smov 0   ;;  %s2021_s7 = smov 0  }
  0x13   :  { %s2023_s8 = smov 0  }
  0x14 LB: > { %2556 = sst [smem:[#allocation17_spill]] %s1919_s26  ;;  %s1381_s9 = sadd.s32 4294967295, %s1947_s8   ;;  %s1947_s8 = sphi %s2023_s8, %s30_s8   ;;  %s1943_s7 = sphi %s2021_s7, %s2608_s7   ;;  %s1939_s30 = sphi %s2019_s30, %s2599_s30   ;;  %s1935_s29 = sphi %s2017_s29, %s2607_s29   ;;  %s1931_s0 = sphi %s2015_s0, %s2598_s0   ;;  %s1927_s28 = sphi %s2013_s28, %s2606_s28   ;;  %s1923_s27 = sphi %s2011_s27, %s2605_s27   ;;  %s1919_s26 = sphi %s2009_s26, %s2604_s26   ;;  %s1915_s25 = sphi %s2007_s25, %s2603_s25   ;;  %s1911_s24 = sphi %s2005_s24, %s2602_s24   ;;  %s1907_s23 = sphi %s2003_s23, %s2601_s23  }
  0x15   : > { %2557 = sst [smem:[#allocation18_spill]] %s1927_s28  ;;  %s1382_s10 = sadd.s32 4294967294, %s1947_s8  }
  0x16   : > { %2558 = sst [smem:[#allocation19_spill]] %s1939_s30  ;;  %s39_s11 = sadd.s32 1, %s1939_s30 }
  0x17   : > { %s42_s12 = sadd.s32 1, %s1943_s7  ;;  %p40_p0 = scmp.ge.s32.totalorder %s39_s11, 3 }
  0x18   : > { %s1383_s13 = sshll.u32 %s1939_s30, 1  ;;  %s80_s15 = sadd.s32 1, %s1927_s28 }
  0x19   : > { %s68_s14 = ssub.s32 2, %s1383_s13  ;;  %s2610_s11 = smov (%p40_p0, %s39_s11), 0 }
  0x1a   : > { %2559 = sst [smem:[#allocation20_spill]] %s2610_s11  ;;  %s2612_s12 = smov (!%p40_p0, %s42_s12), %s1943_s7 }
  0x1b   : > { %s69_s16 = smul.u32 %s1943_s7, %s68_s14  ;;  %s1384_s17 = sshll.u32 %s2610_s11, 1 }
  0x1c   : > { %p44_p1 = scmp.ge.s32.totalorder %s2612_s12, 2  ;;  %s72_s18 = ssub.s32 2, %s1384_s17 }
  0x1d   : > { %s2070_s19 = sadd.s32 %s1939_s30, %s69_s16  ;;  %p87_p2 = scmp.ne.s32.totalorder %s1927_s28, %s1923_s27 }
  0x1e   : > { %s2614_s12 = smov (%p44_p1, %s2612_s12), 0  ;;  %p2544_p3 = scmp.eq.s32.totalorder %s1947_s8, 0 }
  0x1f   : > { %2560 = sst [smem:[#allocation21_spill]] %s2614_s12  ;;  %p93_p4 = scmp.ne.s32.totalorder %s1923_s27, %s1919_s26 }
  0x20   : > { %s73_s20 = smul.u32 %s72_s18, %s2614_s12  ;;  %s2082_s21 = ssub.s32 %s1943_s7, %s2614_s12 }
  0x21   : > { %p2089_p5 = por %p2544_p3, %p87_p2  ;;  %p2093_p6 = scmp.eq.s32.totalorder %s1381_s9, 0 }
  0x22   : > { %s74_s14 = sadd.s32 %s73_s20, %s2610_s11  ;;  %p2110_p9 = scmp.eq.s32.totalorder %s1381_s9, 5 }
  0x23   : > { %s76_s16 = ssub.s32 %s2070_s19, %s74_s14  ;;  %p2105_p8 = por %p2093_p6, %p93_p4 }
  0x24   : > { %s77_s18 = sor.u32 %s76_s16, %s2082_s21  ;;  %p2114_p11 = scmp.eq.s32.totalorder %s1382_s10, 5 }
  0x25   : > { %s2563_s17 = scalar_select %p2105_p8, 1, 0 }
  0x26   : > { %s2564_s12 = scalar_select %p2110_p9, 1, 0 }
  0x27   : > { %p78_p10 = scmp.eq.s32.totalorder %s77_s18, 0  ;;  %p2123_p12 = por %p2110_p9, %p87_p2 }
  0x28   : > { %s2565_s30 = scalar_select %p2114_p11, 1, 0 }
  0x29   : > { %s2566_s20 = scalar_select %p2123_p12, 1, 0 }
  0x2a   : > { %s2128_s14 = scalar_select %p78_p10, %s1927_s28, %s80_s15  }
  0x2b   : > { %2567 = sst [smem:[#allocation22_spill]] %s2566_s20  ;;  %p2135_p13 = por %p2114_p11, %p93_p4 }
  0x2c   : > { %2568 = sst [smem:[#allocation23_spill]] %s2128_s14  ;;  %p2543_p0 = scmp.lt.s32.totalorder %s1947_s8, 6 }
  0x2d   : > { %s2569_s9 = scalar_select %p2135_p13, 1, 0 }
  0x2e   : > { %s234_s10 = sand.u32 1, %s1927_s28   ;;  %s1595_s18 = smul.u32 9, %s2070_s19 }
  0x2f   : > { %2570 = sst [smem:[#allocation24_spill]] %s2569_s9  ;;  %s1563_s16 = smul.u32 36, %s234_s10 }
  0x30   : > { %p2146_p1 = pnand %p2543_p0, %p2089_p5  ;;  %s1565_s15 = smul.u32 27, %s1943_s7 }
  0x31   : > { %s238_s14 = scalar_lea.vmem [#allocation5], %s1563_s16  ;;  %s2572_s2 = sld [smem:[#allocation26_spill]] }
  0x32   : > { %s252_s26 = sshll.u32 %s238_s14, 4  ;;  %s249_s6 = sadd.s32 %s1595_s18, %s1565_s15  ;;  %s2151_s26 = int_to_ptr.vmem [resolvable:$true] %s252_s26 }
  0x33   : > { %s1390_s5 = sshll.u32 %s249_s6, 6  ;;  %s2158_s19 = scalar_lea.sflag [#allocation6], %s234_s10 }
  0x34   : > { %p1731_p4 = pneg %p2146_p1 }
  0x37   : > { %s2156_s28 = scalar_lea.hbm %s2572_s2, %s1390_s5  ;;  %s1734_s20 = scalar_lea.hbm %s2572_s2, 3456 }
  0x38   : > { %s1729_s22 = scalar_lea.hbm %s2156_s28, 576  ;;  %p1735_p0 = scmp.lt.u32.totalorder %s2156_s28, %s2572_s2 }
  0x39   : > { %p1730_p2 = scmp.ne.s32.totalorder %s2156_s28, %s1729_s22  ;;  %p1736_p3 = scmp.lt.u32.totalorder %s1734_s20, %s1729_s22 }
  0x3a   : > { %p1738_p13 = scmp.lt.u32.totalorder %s1729_s22, %s2156_s28 }
  0x3b   : > { %p1732_p5 = pnand %p1731_p4, %p1730_p2  ;;  %p1737_p7 = por %p1736_p3, %p1735_p0 }
  0x3d   : > { %p1733_p10 = pneg %p1732_p5  ;;  %p1739_p12 = por %p1738_p13, %p1737_p7 }
  0x3f   : > { %p1740_p8 = pnand %p1739_p12, %p1733_p10 }
  0x41   : > { %1743 = shalt.err (!%p1740_p8)
}
  0x42   : > { %s1744_s10 = scalar_lea.vmem %s2151_s26, 576  ;;  %s1949_s16 = smov [#allocation5]  }
  0x43   : > { %p1745_p2 = scmp.ne.s32.totalorder %s2151_s26, %s1744_s10  ;;  %s1749_s18 = sshll.u32 %s1949_s16, 4  ;;  %s1750_s18 = int_to_ptr.vmem [resolvable:$false] %s1749_s18 }
  0x44   : > { %s1751_s15 = scalar_lea.vmem %s1750_s18, 1152  ;;  %p1752_p9 = scmp.lt.s32.totalorder %s2151_s26, %s1750_s18 }
  0x45   : > { %p1747_p5 = pnand %p1745_p2, %p1731_p4  ;;  %p1753_p3 = scmp.lt.s32.totalorder %s1751_s15, %s1744_s10 }
  0x47   : > { %p1748_p11 = pneg %p1747_p5  ;;  %p1754_p0 = por %p1753_p3, %p1752_p9 }
  0x49   : > { %p1755_p7 = pnand %p1754_p0, %p1748_p11 }
  0x4b   : > { %1758 = shalt.err (!%p1755_p7)
}
  0x4c   : > { %s1950_s22 = smov 64   ;;  %s1951_s6 = smov 4  }
  0x4d   : > { %1583 = dma.hbm_to_vmem [thread:$0]  (!%p2146_p1), %s2156_s28, 576, %s2151_s26, %s2158_s19, %s1950_s22, %s1950_s22, %s1951_s6  }
  0x4e   : > { %p1392_p8 = scmp.ge.s32.totalorder %s1947_s8, 1  ;;  %p287_p9 = scmp.lt.s32.totalorder %s1947_s8, 7 }
  0x4f   : > { %s106_s20 = sadd.s32 1, %s1915_s25  ;;  %p2574_p12 = scmp.eq.s32.totalorder %s2082_s21, 0 }
  0x50   : > { %p2188_p11 = pnand %p1392_p8, %p287_p9  ;;  %p113_p13 = scmp.ne.s32.totalorder %s1915_s25, %s1911_s24 }
  0x51   : > { %s2196_s5 = scalar_select %p2574_p12, %s1915_s25, %s106_s20  }
  0x52   : > { %p119_p4 = scmp.ne.s32.totalorder %s1911_s24, %s1907_s23  ;;  %s262_s9 = sand.u32 1, %s1915_s25  }
  0x53   : > { %s1567_s10 = smul.u32 768, %s1943_s7  ;;  %p2575_p10 = scmp.eq.s32.totalorder %s1947_s8, 0 }
  0x54   : > { %p2208_p5 = por %p119_p4, %p2093_p6  ;;  %p2577_p1 = scmp.ne.s32.totalorder %s2564_s12, 0 }
  0x55   : > { %p115_p2 = por %p113_p13, %p2575_p10  ;;  %p2579_p0 = scmp.ne.s32.totalorder %s2565_s30, 0 }
  0x56   : > { %s2576_s26 = scalar_select %p2208_p5, 1, 0 }
  0x57   : > { %p2214_p3 = por %p2577_p1, %p113_p13  ;;  %p2220_p7 = por %p2579_p0, %p119_p4 }
  0x58   : > { %s1566_s21 = smul.u32 48, %s262_s9  ;;  %s2581_s3 = sld [smem:[#allocation27_spill]] }
  0x59   : > { %s2578_s28 = scalar_select %p2214_p3, 1, 0 }
  0x5a   : > { %s2580_s11 = scalar_select %p2220_p7, 1, 0 }
  0x5b   : > { %p2582_p6 = scmp.lt.s32.totalorder %s1947_s8, 6  ;;  %s266_s30 = scalar_lea.vmem [#allocation8], %s1566_s21 }
  0x5c   : > { %s273_s13 = sshll.u32 %s266_s30, 4  ;;  %s2237_s15 = scalar_lea.sflag [#allocation9], %s262_s9  ;;  %s2235_s13 = int_to_ptr.vmem [resolvable:$true] %s273_s13 }
  0x5d   : > { %p2231_p8 = pnand %p2582_p6, %p115_p2 }
  0x5e   : > { %s2227_s18 = scalar_lea.hbm %s2581_s3, %s1567_s10  ;;  %s1764_s10 = scalar_lea.hbm %s2581_s3, 1536 }
  0x5f   : > { %s1759_s22 = scalar_lea.hbm %s2227_s18, 768  ;;  %p1761_p12 = pneg %p2231_p8 }
  0x60   : > { %p1760_p9 = scmp.ne.s32.totalorder %s2227_s18, %s1759_s22  ;;  %p1765_p10 = scmp.lt.u32.totalorder %s2227_s18, %s2581_s3 }
  0x61   : > { %p1766_p2 = scmp.lt.u32.totalorder %s1764_s10, %s1759_s22  ;;  %p1768_p0 = scmp.lt.u32.totalorder %s1759_s22, %s2227_s18 }
  0x62   : > { %p1762_p13 = pnand %p1761_p12, %p1760_p9 }
  0x63   : > { %p1767_p1 = por %p1766_p2, %p1765_p10 }
  0x64   : > { %p1763_p4 = pneg %p1762_p13 }
  0x65   : > { %p1769_p6 = por %p1768_p0, %p1767_p1 }
  0x67   : > { %p1770_p7 = pnand %p1769_p6, %p1763_p4 }
  0x69   : > { %1773 = shalt.err (!%p1770_p7)
}
  0x6a   : > { %s1774_s9 = scalar_lea.vmem %s2235_s13, 768  ;;  %s1952_s21 = smov [#allocation8]  }
  0x6b   : > { %p1775_p9 = scmp.ne.s32.totalorder %s2235_s13, %s1774_s9  ;;  %s1779_s30 = sshll.u32 %s1952_s21, 4  ;;  %s1780_s30 = int_to_ptr.vmem [resolvable:$false] %s1779_s30 }
  0x6c   : > { %s1781_s6 = scalar_lea.vmem %s1780_s30, 1536  ;;  %p1782_p5 = scmp.lt.s32.totalorder %s2235_s13, %s1780_s30 }
  0x6d   : > { %p1777_p13 = pnand %p1775_p9, %p1761_p12  ;;  %p1783_p10 = scmp.lt.s32.totalorder %s1781_s6, %s1774_s9 }
  0x6f   : > { %p1778_p3 = pneg %p1777_p13  ;;  %p1784_p2 = por %p1783_p10, %p1782_p5 }
  0x71   : > { %p1785_p1 = pnand %p1784_p2, %p1778_p3 }
  0x73   : > { %1788 = shalt.err (!%p1785_p1)
}
  0x74   : > { %s1953_s22 = smov 128   ;;  %s1954_s20 = smov 8  }
  0x75   : > { %1586 = dma.hbm_to_vmem [thread:$0]  (!%p2231_p8), %s2227_s18, 768, %s2235_s13, %s2237_s15, %s1953_s22, %s1953_s22, %s1954_s20  }
  0x76   : > { %291 = sbr.rel (%p2188_p11) target bundleno = 997 (0x3e5), region = 36  ;;  %s2268_s10 = sand.u32 (!%p2188_p11), 1, %s1923_s27  }
  0x77   : > { %s1568_s19 = smul.u32 (!%p2188_p11), 36, %s2268_s10  ;;  %s294_s16 = scalar_lea.sflag (!%p2188_p11), [#allocation6], %s2268_s10 }
  0x78   : > { %p2584_p5 = scmp.ne.s32.totalorder (!%p2188_p11), %s2563_s17, 0 }
  0x79   : > { %s2272_s9 = scalar_lea.vmem (!%p2188_p11), [#allocation5], %s1568_s19 }
  0x7d   : > { %1890 = dma.done.wait (%p2584_p5), %s294_s16, 576  }
  0x7e   : > { %1892 = vsyncadd (%p2584_p5), %s294_s16, 4294966720  ;;  %s2279_s18 = sand.u32 1, %s1911_s24   ;;  %p2585_p11 = scmp.ne.s32.totalorder %s2576_s26, 0 }
  0x7f   : > { %s1569_s14 = smul.u32 48, %s2279_s18  ;;  %s303_s12 = scalar_lea.sflag [#allocation9], %s2279_s18 }
  0x81   : > { %s2283_s13 = scalar_lea.vmem [#allocation8], %s1569_s14 }
  0x82   : > { %1894 = dma.done.wait (%p2585_p11), %s303_s12, 768  }
  0x83   : > { %1896 = vsyncadd (%p2585_p11), %s303_s12, 4294966528  ;;  %s1570_s17 = smul.u32 12, %s2268_s10  ;;  %s1393_s15 = sshll.u32 %s2279_s18, 2 }
  0x84   : > { %s2291_s21 = sld [smem:[#allocation4]]  ;;  %p351_p3 = scmp.lt.s32.totalorder %s1935_s29, 1 }
  0x85   : > { %s1394_s30 = sshll.u32 %s1931_s0, 1  ;;  %s2306_s2 = scalar_lea.vmem [#allocation10], %s1570_s17 }
  0x86   : > { %s2296_s6 = scalar_select %p351_p3, %s1935_s29, 1 }
  0x87   : > { %s361_s22 = ssub.s32 2, %s1394_s30  ;;  %s2308_s3 = scalar_lea.vmem [#allocation11], %s1393_s15 }
  0x88   : > { %s353_s19 = scalar_lea.vmem %s2530_s4, %s2296_s6  ;;  %s362_s16 = smul.u32 %s1935_s29, %s361_s22 }
  0x89   : > { %p1395_p7 = scmp.ne.s32.totalorder %s1931_s0, 0 }
  0x8a   : > { %s363_s14 = sadd.s32 %s1931_s0, %s362_s16  ;;  %vm369_vm0 = vcmask (!%p1395_p7), 125952   ;;  %v1955_v0 = vmov (!%p1395_p7), 0.0  }
  0x8b   : > { %s2304_s12 = smul.u32 3, %s363_s14  ;;  %370 = vst.msk [vmem:[#allocation2] sm:$0xf] (!%p1395_p7), %vm369_vm0, %v1955_v0 }
  0x8c   : > { %368 = sbr.rel (%p1395_p7) target bundleno = 147 (0x93), region = 48 }
  0x93 PF: > { %p1396_p8 = scmp.ge.s32.totalorder %s2304_s12, %s2291_s21 }
  0x94   : > { %v391_v1 = vld [vmem:[%s2283_s13] sm:$0xff] (!%p1396_p8)  ;;  %v392_v2 = vld [vmem:[%s2283_s13 + $0x8] sm:$0xff] (!%p1396_p8)  ;;  %v1956_v3 = vmov (!%p1396_p8), 0.0|0.0   ;;  %vm1957_vm1 = vmmov (!%p1396_p8), 0   ;;  %v1958_v5 = vmov (!%p1396_p8), 0.0   ;;  %v1401_v6 = vld [vmem:[%s2283_s13 + $0x10] sm:$0xff] (!%p1396_p8) }
  0x95   : > { %374 = sbr.rel (%p1396_p8) target bundleno = 935 (0x3a7), region = 52  ;;  %1536 = vmatprep.subr.bf16.mxu0 (!%p1396_p8), %v1956_v3  ;;  %v2316_v4 = vpack.c.bf16 (!%p1396_p8), %v392_v2, %v391_v1  ;;  %1477 = vmatprep.mubr.msk.f32.mxu0 (!%p1396_p8), %vm1957_vm1, %v1958_v5  ;;  %v1402_v7 = vld [vmem:[%s2283_s13 + $0x18] sm:$0xff] (!%p1396_p8)  ;;  %s1398_s0 = sshll.u32 (!%p1396_p8), %s1935_s29, 1  ;;  %v1404_v9 = vld [vmem:[%s2283_s13 + $0x20] sm:$0xff] (!%p1396_p8)  ;;  %v1405_v10 = vld [vmem:[%s2283_s13 + $0x28] sm:$0xff] (!%p1396_p8)  ;;  %vm393_vm2 = vcmask (!%p1396_p8), 130048  }
  0x96   : > { %1539 = vmatprep.subr.bf16.mxu1 (!%p1396_p8), %v1956_v3  ;;  %v2324_v8 = vpack.c.bf16 (!%p1396_p8), %v1402_v7, %v1401_v6  ;;  %1484 = vmatprep.mubr.msk.f32.mxu1 (!%p1396_p8), %vm1957_vm1, %v1958_v5  ;;  %s2586_s1 = sld [smem:[#allocation25_spill]] (!%p1396_p8)  ;;  %s385_s30 = sadd.s32 (!%p1396_p8), %s1398_s0, %s2304_s12  ;;  %v2338_v12 = vld [vmem:[#allocation2] sm:$0xf] (!%p1396_p8)  ;;  %v2340_v13 = vpack.c.bf16 (!%p1396_p8), %v1405_v10, %v1404_v9  ;;  %v1959_v14 = vmov (!%p1396_p8), 0   ;;  %vm644_vm6 = vcmask (!%p1396_p8), 125952  }
  0x97   : > { %s647_s22 = sadd.s32 (!%p1396_p8), 1, %s2304_s12  ;;  %1538 = vmatpush3.bf16.msra.mxu0 (!%p1396_p8), %v2316_v4  ;;  %1697 = vset.pattern.permute.xlu0 (!%p1396_p8), %v1959_v14  ;;  %v634_v15 = vstv (!%p1396_p8), %s385_s30  ;;  %s1399_s13 = smul.u32 (!%p1396_p8), 24, %s1935_s29  ;;  %v2376_v34 = vld [vmem:[%s353_s19] ss:$0 sm:$0xff] (!%p1396_p8)  ;;  %v1410_v52 = vld [vmem:[%s2272_s9 + $0xc] sm:$0xf] (!%p1396_p8) }
  0x98   : > { %v892_v16 = vstv (!%p1396_p8), %s647_s22  ;;  %1541 = vmatpush3.bf16.msra.mxu1 (!%p1396_p8), %v2324_v8  ;;  %1542 = vmatprep.subr.bf16.mxu0 (!%p1396_p8), %v1956_v3  ;;  %s1445_s14 = sshll.u32 (!%p1396_p8), %s1935_s29, 3  ;;  %s903_s19 = smul.u32 (!%p1396_p8), 4294967294, %s1935_s29  ;;  %v1411_v56 = vld [vmem:[%s2272_s9 + $0x10] sm:$0xf] (!%p1396_p8)  ;;  %v1412_v7 = vld [vmem:[%s2272_s9 + $0x14] sm:$0xf] (!%p1396_p8) }
  0x99   : > { %1545 = vmatprep.subr.bf16.mxu1 (!%p1396_p8), %v1956_v3  ;;  %1698 = vset.pattern.permute.xlu1 (!%p1396_p8), %v1959_v14  ;;  %s387_s20 = scalar_lea.vmem (!%p1396_p8), %s2272_s9, %s1399_s13 [#allocation5]  ;;  %s643_s6 = scalar_lea.vmem (!%p1396_p8), %s2306_s2, %s1445_s14 [#allocation10] }
  0x9a   : > { %1478 = vmatmul.mubr.msk.f32.vlgmr.msra.gmra.mrb[0].mxu0 (!%p1396_p8), %vm393_vm2, %v2338_v12  ;;  %v388_v19 = vld [vmem:[%s387_s20] sm:$0xf] (!%p1396_p8)  ;;  %v389_v20 = vld [vmem:[%s387_s20 + $0x4] sm:$0xf] (!%p1396_p8)  ;;  %v390_v38 = vld [vmem:[%s387_s20 + $0x8] sm:$0xf] (!%p1396_p8) }
  0x9b   : > { %1485 = vmatmul.mubr.msk.f32.vlgmr.msra.gmra.mrb[0].mxu1 (!%p1396_p8), %vm393_vm2, %v2338_v12  ;;  %1544 = vmatpush3.bf16.msra.mxu0 (!%p1396_p8), %v2340_v13  ;;  %s904_s0 = sadd.s32 (!%p1396_p8), 2, %s903_s19  ;;  %s1423_s15 = smul.u32 (!%p1396_p8), 4294967272, %s1935_s29 }
  0x9c   : > { %v2333_v11 = vld [vmem:[%s2586_s1] sm:$0xf]  ;;  %1491 = vmatprep.mubr.msk.f32.mxu0 %vm1957_vm1, %v1958_v5  ;;  %1547 = vmatpush3.bf16.msra.mxu1 %v2316_v4  ;;  %s905_s17 = sadd.s32 %s904_s0, %s2304_s12 }
  0x9d   : > { %vm635_vm3 = vcmp.gt.s32.totalorder %v2333_v11, %v634_v15  ;;  %vm893_vm4 = vcmp.gt.s32.totalorder %v2333_v11, %v892_v16  ;;  %1548 = vmatprep.subr.bf16.mxu0 %v1956_v3  ;;  %1498 = vmatprep.mubr.msk.f32.mxu1 %vm1957_vm1, %v1958_v5  ;;  %v1151_v50 = vstv %s905_s17  ;;  %s1296_s30 = scalar_lea.vmem %s2272_s9, %s1423_s15 [#allocation5]  ;;  %s1436_s9 = smul.u32 4294967288, %s1935_s29 }
  0x9e   : > { %v636_v17 = vsel %vm635_vm3, 1, %v1959_v14  ;;  %v894_v18 = vsel %vm893_vm4, 1, %v1959_v14  ;;  %1492 = vmatmul.mubr.msk.f32.vlgmr.msra.gmra.mrb[2].mxu0 %vm393_vm2, %v2338_v12  ;;  %1551 = vmatprep.subr.bf16.mxu1 %v1956_v3  ;;  %vm1152_vm7 = vcmp.gt.s32.totalorder %v2333_v11, %v1151_v50 }
  0x9f   : > { %638 = vperm.xlu0 %1697, %v636_v17   ;;  %1550 = vmatpush3.bf16.msra.mxu0 %v2324_v8  ;;  %v1153_v51 = vsel %vm1152_vm7, 1, %v1959_v14  ;;  %s1300_s22 = scalar_lea.vmem %s2306_s2, %s1436_s9 [#allocation10] }
  0xa0   : > { %1505 = vmatprep.mubr.msk.f32.mxu0 %vm1957_vm1, %v1958_v5  ;;  %1554 = vmatprep.subr.bf16.mxu0 %v1956_v3 }
  0xa1   : > { %1155 = vperm.xlu1 %1698, %v1153_v51  }
  0xa3   : > { %896 = vperm.xlu0 %1697, %v894_v18  }
 0x11e   : > { %v639_v46 = vpop.permute.xlu0 %638 }
 0x11f   : > { %vm640_vm5 = vcmp.eq.s32.totalorder %v639_v46, 1 }
 0x122   : > { %v897_v14 = vpop.permute.xlu0 %896 }
 0x123   : > { %vm898_vm8 = vcmp.eq.s32.totalorder %v897_v14, 1 }
 0x16d   : > { %v463_v21 = vpop.f32.mrb[0].mxu0 }
 0x16e   : > { %v543_v22 = vadd.f32 %v463_v21, %v388_v19  ;;  %v1479_v23 = vpop.f32.mrb[1].mxu0  ;;  %v536_v24 = vpop.f32.mrb[0].mxu1 }
 0x16f   : > { %v550_v25 = vadd.f32 %v536_v24, %v389_v20  ;;  %v1486_v26 = vpop.f32.mrb[1].mxu1  ;;  %v1424_v20 = vld [vmem:[%s1296_s30 + $0x18] sm:$0xf]  ;;  %v1425_v24 = vld [vmem:[%s1296_s30 + $0x1c] sm:$0xf] }
 0x170   : > { %v1406_v27 = vmul.f32 -1.442695, %v543_v22 }
 0x171   : > { %v623_v28 = vpop.f32.mrb[2].mxu0  ;;  %v1407_v30 = vmul.f32 -1.442695, %v550_v25 }
 0x172   : > { %1699 = vpow2.f32 %v1406_v27  ;;  %v1493_v29 = vpop.f32.mrb[3].mxu0  ;;  %v624_v36 = vadd.f32 %v2376_v34, %v623_v28 }
 0x173   : > { %1701 = vpow2.f32 %v1407_v30 }
 0x17c   : > { %v1700_v31 = vpop.eup %1699 }
 0x17d   : > { %v547_v32 = vadd.f32 1.0, %v1700_v31  ;;  %v1702_v33 = vpop.eup %1701 }
 0x17e   : > { %v554_v35 = vadd.f32 1.0, %v1702_v33 }
 0x17f   : > { %1703 = vrcp.f32 %v547_v32 }
 0x180   : > { %1705 = vrcp.f32 %v554_v35 }
 0x189   : > { %v1704_v37 = vpop.eup %1703 }
 0x18a   : > { %v627_v39 = vmul.f32 %v1704_v37, %v624_v36  ;;  %v1706_v41 = vpop.eup %1705  ;;  %v1426_v37 = vld [vmem:[%s1296_s30 + $0x20] sm:$0xf] }
 0x18b   : > { %v630_v42 = vsub.f32 1.0, %v1706_v41  ;;  %v632_v45 = vmul.f32 %v1706_v41, %v2338_v12  ;;  %v1156_v41 = vpop.permute.xlu1 %1155 }
 0x18c   : > { %v628_v40 = vadd.f32 %v627_v39, %v390_v38  ;;  %vm1157_vm9 = vcmp.eq.s32.totalorder %v1156_v41, 1 }
 0x18e   : > { %1707 = vtanh.f32 %v628_v40 }
 0x198   : > { %v1708_v43 = vpop.eup %1707 }
 0x199   : > { %v631_v44 = vmul.f32 %v1708_v43, %v630_v42 }
 0x19b   : > { %v633_v47 = vadd.f32 %v632_v45, %v631_v44 }
 0x19d   : > { %v641_v48 = vsel %vm640_vm5, %v633_v47, 0.0  ;;  %v646_v49 = vsel %vm640_vm5, %v633_v47, %v2338_v12 }
 0x19e   : > { %645 = vst.msk [vmem:[%s643_s6] sm:$0xf] %vm644_vm6, %v641_v48  ;;  %1499 = vmatmul.mubr.msk.f32.vlgmr.msra.gmra.mrb[2].mxu1 %vm393_vm2, %v646_v49  ;;  %1506 = vmatmul.mubr.msk.f32.vlgmr.msra.gmra.mrb[4].mxu0 %vm393_vm2, %v646_v49 }
 0x19f   : > { %1553 = vmatpush3.bf16.msra.mxu1 %v2340_v13  ;;  %1512 = vmatprep.mubr.msk.f32.mxu1 %vm1957_vm1, %v1958_v5 }
 0x1a0   : > { %1556 = vmatpush3.bf16.msra.mxu0 %v2316_v4  ;;  %1557 = vmatprep.subr.bf16.mxu1 %v1956_v3 }
 0x1a1   : > { %1519 = vmatprep.mubr.msk.f32.mxu0 %vm1957_vm1, %v1958_v5  ;;  %1560 = vmatprep.subr.bf16.mxu0 %v1956_v3 }
 0x1a2   : > { %1513 = vmatmul.mubr.msk.f32.vlgmr.msra.gmra.mrb[4].mxu1 %vm393_vm2, %v646_v49 }
 0x1a3   : > { %1559 = vmatpush3.bf16.msra.mxu1 %v2324_v8  ;;  %1526 = vmatprep.mubr.msk.f32.mxu1 %vm1957_vm1, %v1958_v5 }
 0x271   : > { %v723_v53 = vpop.f32.mrb[2].mxu1  ;;  %v795_v54 = vpop.f32.mrb[4].mxu0 }
 0x272   : > { %v801_v55 = vadd.f32 %v1410_v52, %v723_v53  ;;  %v1500_v57 = vpop.f32.mrb[3].mxu1  ;;  %v1507_v58 = vpop.f32.mrb[5].mxu0  ;;  %v808_v60 = vadd.f32 %v1411_v56, %v795_v54 }
 0x274   : > { %v1419_v59 = vmul.f32 -1.442695, %v801_v55  ;;  %v1420_v63 = vmul.f32 -1.442695, %v808_v60 }
 0x275   : > { %v881_v61 = vpop.f32.mrb[4].mxu1 }
 0x276   : > { %1709 = vpow2.f32 %v1419_v59  ;;  %v1514_v62 = vpop.f32.mrb[5].mxu1  ;;  %v882_v4 = vadd.f32 %v2376_v34, %v881_v61 }
 0x277   : > { %1711 = vpow2.f32 %v1420_v63 }
 0x280   : > { %v1710_v0 = vpop.eup %1709 }
 0x281   : > { %v805_v1 = vadd.f32 1.0, %v1710_v0  ;;  %v1712_v2 = vpop.eup %1711 }
 0x282   : > { %v812_v3 = vadd.f32 1.0, %v1712_v2 }
 0x283   : > { %1713 = vrcp.f32 %v805_v1 }
 0x284   : > { %1715 = vrcp.f32 %v812_v3 }
 0x28d   : > { %v1714_v6 = vpop.eup %1713 }
 0x28e   : > { %v885_v8 = vmul.f32 %v1714_v6, %v882_v4  ;;  %v1716_v10 = vpop.eup %1715 }
 0x28f   : > { %v888_v11 = vsub.f32 1.0, %v1716_v10  ;;  %v890_v16 = vmul.f32 %v1716_v10, %v646_v49 }
 0x290   : > { %v886_v9 = vadd.f32 %v1412_v7, %v885_v8 }
 0x292   : > { %1717 = vtanh.f32 %v886_v9 }
 0x29c   : > { %v1718_v12 = vpop.eup %1717 }
 0x29d   : > { %v889_v15 = vmul.f32 %v1718_v12, %v888_v11 }
 0x29f   : > { %v891_v17 = vadd.f32 %v890_v16, %v889_v15 }
 0x2a1   : > { %v899_v18 = vsel %vm898_vm8, %v891_v17, 0.0  ;;  %v902_v19 = vsel %vm898_vm8, %v891_v17, %v646_v49 }
 0x2a2   : > { %1520 = vmatmul.mubr.msk.f32.vlgmr.msra.gmra.mrb[6].mxu0 %vm393_vm2, %v902_v19  ;;  %1422 = vst.msk [vmem:[%s2306_s2 + $0x4] sm:$0xf] %vm644_vm6, %v899_v18  ;;  %1527 = vmatmul.mubr.msk.f32.vlgmr.msra.gmra.mrb[6].mxu1 %vm393_vm2, %v902_v19 }
 0x2a3   : > { %1562 = vmatpush3.bf16.msra.mxu0 %v2340_v13  ;;  %1533 = vmatprep.mubr.msk.f32.mxu0 %vm1957_vm1, %v1958_v5 }
 0x2a6   : > { %1534 = vmatmul.mubr.msk.f32.vlgmr.msra.gmra.mrb[8].mxu0 %vm393_vm2, %v902_v19 }
 0x375   : > { %v982_v21 = vpop.f32.mrb[6].mxu0  ;;  %v1054_v22 = vpop.f32.mrb[6].mxu1 }
 0x376   : > { %v1060_v23 = vadd.f32 %v1424_v20, %v982_v21  ;;  %v1521_v25 = vpop.f32.mrb[7].mxu0  ;;  %v1528_v26 = vpop.f32.mrb[7].mxu1  ;;  %v1067_v28 = vadd.f32 %v1425_v24, %v1054_v22 }
 0x378   : > { %v1433_v27 = vmul.f32 -1.442695, %v1060_v23  ;;  %v1434_v13 = vmul.f32 -1.442695, %v1067_v28 }
 0x379   : > { %v1140_v29 = vpop.f32.mrb[8].mxu0 }
 0x37a   : > { %1719 = vpow2.f32 %v1433_v27  ;;  %v1535_v30 = vpop.f32.mrb[9].mxu0  ;;  %v1141_v35 = vadd.f32 %v2376_v34, %v1140_v29 }
 0x37b   : > { %1721 = vpow2.f32 %v1434_v13 }
 0x384   : > { %v1720_v5 = vpop.eup %1719 }
 0x385   : > { %v1064_v31 = vadd.f32 1.0, %v1720_v5  ;;  %v1722_v32 = vpop.eup %1721 }
 0x386   : > { %v1071_v33 = vadd.f32 1.0, %v1722_v32 }
 0x387   : > { %1723 = vrcp.f32 %v1064_v31 }
 0x388   : > { %1725 = vrcp.f32 %v1071_v33 }
 0x391   : > { %v1724_v36 = vpop.eup %1723 }
 0x392   : > { %v1144_v38 = vmul.f32 %v1724_v36, %v1141_v35  ;;  %v1726_v40 = vpop.eup %1725 }
 0x393   : > { %v1147_v42 = vsub.f32 1.0, %v1726_v40  ;;  %v1149_v45 = vmul.f32 %v1726_v40, %v902_v19 }
 0x394   : > { %v1145_v39 = vadd.f32 %v1426_v37, %v1144_v38 }
 0x396   : > { %1727 = vtanh.f32 %v1145_v39 }
 0x3a0   : > { %v1728_v43 = vpop.eup %1727 }
 0x3a1   : > { %v1148_v44 = vmul.f32 %v1728_v43, %v1147_v42 }
 0x3a3   : > { %v1150_v46 = vadd.f32 %v1149_v45, %v1148_v44 }
 0x3a5   : > { %v1158_v47 = vsel %vm1157_vm9, %v1150_v46, 0.0  ;;  %v1162_v48 = vsel %vm1157_vm9, %v1150_v46, %v902_v19 }
 0x3a6   : > { %1437 = vst.msk [vmem:[%s1300_s22 + $0x8] sm:$0xf] %vm644_vm6, %v1158_v47  ;;  %1163 = vst.msk [vmem:[#allocation2] sm:$0xf] %vm644_vm6, %v1162_v48 }
 0x3a7 PF: > { %p1438_p12 = scmp.lt.s32.totalorder %s2304_s12, %s2291_s21 }
 0x3a8   : > { %vm1168_vm10 = vcmask (!%p1438_p12), 125952   ;;  %v1960_v34 = vmov (!%p1438_p12), 0.0  }
 0x3a9   : > { %1167 = sbr.rel (%p1438_p12) target bundleno = 944 (0x3b0), region = 56  ;;  %1169 = vst.msk [vmem:[%s2306_s2] sm:$0xf] (!%p1438_p12), %vm1168_vm10, %v1960_v34  ;;  %1170 = vst.msk [vmem:[%s2306_s2 + $0x4] sm:$0xf] (!%p1438_p12), %vm1168_vm10, %v1960_v34 }
 0x3aa   : > { %1171 = vst.msk [vmem:[%s2306_s2 + $0x8] sm:$0xf] (!%p1438_p12), %vm1168_vm10, %v1960_v34 }
 0x3b0 PF: > { %v1172_v49 = vld [vmem:[#allocation2] sm:$0xf]  ;;  %s2587_s13 = sld [smem:[#allocation22_spill]]  ;;  %vm1173_vm11 = vcmask 125952   ;;  %s1571_s20 = smul.u32 9, %s1935_s29 }
 0x3b1   : > { %1174 = vst.msk [vmem:[%s2308_s3] sm:$0xf] %vm1173_vm11, %v1172_v49  ;;  %s1200_s21 = sshll.u32 %s2306_s2, 4  ;;  %s2588_s19 = sld [smem:[#allocation28_spill]]  ;;  %s2430_s21 = int_to_ptr.vmem [resolvable:$true] %s1200_s21 }
 0x3b2   : > { %s1197_s26 = sadd.s32 %s1571_s20, %s2304_s12  ;;  %s1176_s17 = scalar_lea.sflag [#allocation7], %s2268_s10 }
 0x3b3   : > { %s1441_s16 = sshll.u32 %s1197_s26, 6  ;;  %s1789_s15 = scalar_lea.vmem %s2430_s21, 192 }
 0x3b4   : > { %p1790_p4 = scmp.ne.s32.totalorder %s2430_s21, %s1789_s15  ;;  %s1961_s30 = smov [#allocation10]  }
 0x3b5   : > { %s1793_s2 = sshll.u32 %s1961_s30, 4  ;;  %s1794_s2 = int_to_ptr.vmem [resolvable:$false] %s1793_s2 }
 0x3b6   : > { %p2589_p0 = scmp.ne.s32.totalorder %s2587_s13, 0  ;;  %s1795_s12 = scalar_lea.vmem %s1794_s2, 384 }
 0x3b7   : > { %s2435_s0 = scalar_lea.hbm %s2588_s19, %s1441_s16  ;;  %p1796_p13 = scmp.lt.s32.totalorder %s2430_s21, %s1794_s2 }
 0x3b8   : > { %p1791_p6 = pnand %p1790_p4, %p2589_p0  ;;  %p1797_p10 = scmp.lt.s32.totalorder %s1795_s12, %s1789_s15 }
 0x3ba   : > { %p1792_p9 = pneg %p1791_p6  ;;  %p1798_p2 = por %p1797_p10, %p1796_p13 }
 0x3bc   : > { %p1799_p1 = pnand %p1798_p2, %p1792_p9 }
 0x3be   : > { %1802 = shalt.err (!%p1799_p1)
}
 0x3bf   : > { %s1803_s9 = scalar_lea.hbm %s2435_s0, 192  ;;  %s1807_s26 = scalar_lea.hbm %s2588_s19, 1152 }
 0x3c0   : > { %p1804_p5 = scmp.ne.s32.totalorder %s2435_s0, %s1803_s9  ;;  %p1808_p7 = scmp.lt.u32.totalorder %s2435_s0, %s2588_s19 }
 0x3c1   : > { %p1809_p8 = scmp.lt.u32.totalorder %s1807_s26, %s1803_s9  ;;  %p1811_p4 = scmp.lt.u32.totalorder %s1803_s9, %s2435_s0 }
 0x3c2   : > { %p1805_p11 = pnand %p1804_p5, %p2589_p0 }
 0x3c3   : > { %p1810_p12 = por %p1809_p8, %p1808_p7 }
 0x3c4   : > { %p1806_p3 = pneg %p1805_p11 }
 0x3c5   : > { %p1812_p6 = por %p1811_p4, %p1810_p12 }
 0x3c7   : > { %p1813_p9 = pnand %p1812_p6, %p1806_p3 }
 0x3c9   : > { %1816 = shalt.err (!%p1813_p9)
}
 0x3ca   : > { %s1962_s6 = smov 64   ;;  %s1963_s15 = smov 4  }
 0x3cb   : > { %1576 = dma.vmem_to_hbm [thread:$0]  (%p2589_p0), %s2430_s21, 192, %s2435_s0, %s1176_s17, %s1962_s6, %s1962_s6, %s1963_s15  }
 0x3cc   : > { %s1442_s30 = sshll.u32 %s1935_s29, 6  ;;  %s1216_s2 = sshll.u32 %s2308_s3, 4  ;;  %s1217_s2 = int_to_ptr.vmem [resolvable:$true] %s1216_s2 }
 0x3cd   : > { %s2590_s22 = sld [smem:[#allocation29_spill]]  ;;  %s1181_s26 = scalar_lea.sflag [#allocation12], %s2279_s18 }
 0x3ce   : > { %s1817_s16 = scalar_lea.vmem %s1217_s2, 64  ;;  %p2591_p10 = scmp.ne.s32.totalorder %s2578_s28, 0 }
 0x3cf   : > { %p1818_p13 = scmp.ne.s32.totalorder %s1217_s2, %s1817_s16  ;;  %s1964_s14 = smov [#allocation11]  }
 0x3d0   : > { %s1821_s1 = sshll.u32 %s1964_s14, 4  ;;  %s1822_s1 = int_to_ptr.vmem [resolvable:$false] %s1821_s1 }
 0x3d1   : > { %p1819_p2 = pnand %p1818_p13, %p2591_p10  ;;  %s1823_s13 = scalar_lea.vmem %s1822_s1, 128 }
 0x3d2   : > { %p1824_p5 = scmp.lt.s32.totalorder %s1217_s2, %s1822_s1  ;;  %p1825_p0 = scmp.lt.s32.totalorder %s1823_s13, %s1817_s16 }
 0x3d3   : > { %s2466_s20 = scalar_lea.hbm %s2590_s22, %s1442_s30  ;;  %p1820_p1 = pneg %p1819_p2 }
 0x3d4   : > { %p1826_p11 = por %p1825_p0, %p1824_p5 }
 0x3d6   : > { %p1827_p3 = pnand %p1826_p11, %p1820_p1 }
 0x3d8   : > { %1830 = shalt.err (!%p1827_p3)
}
 0x3d9   : > { %s1831_s3 = scalar_lea.hbm %s2466_s20, 64  ;;  %s1835_s18 = scalar_lea.hbm %s2590_s22, 128 }
 0x3da   : > { %p1832_p7 = scmp.ne.s32.totalorder %s2466_s20, %s1831_s3  ;;  %p1836_p4 = scmp.lt.u32.totalorder %s2466_s20, %s2590_s22 }
 0x3db   : > { %p1837_p6 = scmp.lt.u32.totalorder %s1835_s18, %s1831_s3  ;;  %p1839_p13 = scmp.lt.u32.totalorder %s1831_s3, %s2466_s20 }
 0x3dc   : > { %p1833_p8 = pnand %p1832_p7, %p2591_p10 }
 0x3dd   : > { %p1838_p9 = por %p1837_p6, %p1836_p4 }
 0x3de   : > { %p1834_p12 = pneg %p1833_p8 }
 0x3df   : > { %p1840_p2 = por %p1839_p13, %p1838_p9 }
 0x3e1   : > { %p1841_p1 = pnand %p1840_p2, %p1834_p12 }
 0x3e3   : > { %1844 = shalt.err (!%p1841_p1)
}
 0x3e4   : > { %1577 = dma.vmem_to_hbm [thread:$0]  (%p2591_p10), %s1217_s2, 64, %s2466_s20, %s1181_s26  }
 0x3e5 PF: > { %s2592_s0 = sld [smem:[#allocation17_spill]]  ;;  %s2593_s17 = sld [smem:[#allocation24_spill]] }
 0x3e6   : > { %p1596_p5 = scmp.ge.s32.totalorder %s1947_s8, 2 }
 0x3eb   : > { %s1228_s6 = sand.u32 1, %s2592_s0   ;;  %p2594_p0 = scmp.ne.s32.totalorder %s2593_s17, 0 }
 0x3ec   : > { %s1229_s15 = scalar_lea.sflag [#allocation7], %s1228_s6 }
 0x3ed   : > { %p1588_p11 = pnand %p1596_p5, %p2594_p0 }
 0x3ef   : > { %1898 = dma.done.wait (!%p1588_p11), %s1229_s15, 192  }
 0x3f0   : > { %1900 = vsyncadd (!%p1588_p11), %s1229_s15, 4294967104  ;;  %s1237_s30 = sand.u32 1, %s1907_s23   ;;  %p2595_p3 = scmp.ne.s32.totalorder %s2580_s11, 0 }
 0x3f1   : > { %s1238_s12 = scalar_lea.sflag [#allocation12], %s1237_s30 }
 0x3f2   : > { %p1591_p7 = pnand %p1596_p5, %p2595_p3 }
 0x3f4   : > { %1902 = dma.done.wait (!%p1591_p7), %s1238_s12, 64  }
 0x3f5   : > { %1904 = vsyncadd (!%p1591_p7), %s1238_s12, 4294967232  ;;  %s30_s8 = sadd.s32 1, %s1947_s8   ;;  %s2596_s28 = sld [smem:[#allocation18_spill]] }
 0x3f6   : > { %p27_p10 = scmp.ge.s32.totalorder %s30_s8, 8   ;;  %s2597_s2 = sld [smem:[#allocation23_spill]] }
 0x3f7   : > { %s2598_s0 = sld [smem:[#allocation19_spill]]  ;;  %s2599_s30 = sld [smem:[#allocation20_spill]] }
 0x3f8   : > { %s2600_s9 = sld [smem:[#allocation21_spill]]  ;;  %s2601_s23 = smov %s1911_s24 }
 0x3f9   : > { %s2602_s24 = smov %s1915_s25  ;;  %s2603_s25 = smov %s2196_s5 }
 0x3fa   : > { %s2604_s26 = smov %s1923_s27  ;;  %s2607_s29 = smov %s1943_s7 }
 0x3fb   : > { %s2605_s27 = smov %s2596_s28  ;;  %29 = sbr.rel (!%p27_p10) target bundleno = 20 (0x14), region = 134 }
 0x3fc   : > { %s2606_s28 = smov %s2597_s2 }
 0x3fe   : > { %s2608_s7 = smov %s2600_s9 }
 0x402   :  { %1243 = vsyncpa [#allocation6], 1 }
 0x403   :  { %1245 = vsyncpa [#allocation6 + $0x1], 1 }
 0x404   :  { %1246 = vsyncpa [#allocation9], 1 }
 0x405   :  { %1248 = vsyncpa [#allocation9 + $0x1], 1 }
 0x406   :  { %1249 = vsyncpa [#allocation7], 1 }
 0x407   :  { %1251 = vsyncpa [#allocation7 + $0x1], 1 }
 0x408   :  { %1252 = vsyncpa [#allocation12], 1 }
 0x409   :  { %1254 = vsyncpa [#allocation12 + $0x1], 1 }

</bundles_post_ra>
